<compile_context>
chip_gen: v7x
topology: tpu7x:2x2x1
jax: 0.10.0
libtpu: 0.0.40
codegen_flags: <defaults>
</compile_context>

<pallas_src>
import functools

import jax
import jax.numpy as jnp
from jax.experimental import pallas as pl
from jax.experimental.pallas import tpu as pltpu


def _disc_kernel(real_ref, fake_ref,
                 w1_ref, b1_ref,
                 w2_ref, b2_ref,
                 w3_ref, b3_ref,
                 wv_ref, bv_ref,
                 out_ref):
    w1 = w1_ref[...]
    b1 = b1_ref[...]
    w2 = w2_ref[...]
    b2 = b2_ref[...]
    w3 = w3_ref[...]
    b3 = b3_ref[...]
    wv = wv_ref[...]
    bv = bv_ref[...]

    def half_logits(x):
        # Cast per-tile (lets the wrapper stream bf16 ratings from HBM if the
        # caller stores them that way; f32 inputs are a no-op cast).
        x = x.astype(jnp.float32)
        inv_m = jnp.float32(1.0 / x.shape[1])

        # Pass 1: mean.
        mean = jnp.sum(x, axis=1, keepdims=True) * inv_m            # (TB, 1)

        # Pass 2: centered moments with explicit multiplies (no pow, no
        # full-width divide).
        d = x - mean
        d2 = d * d
        d3 = d2 * d
        d4 = d2 * d2
        m2 = jnp.sum(d2, axis=1, keepdims=True) * inv_m              # (TB, 1)
        m3 = jnp.sum(d3, axis=1, keepdims=True) * inv_m
        m4 = jnp.sum(d4, axis=1, keepdims=True) * inv_m

        std = jnp.sqrt(m2)
        inv = 1.0 / (std + 1e-6)        # exact divide on a (TB,1) column only
        inv2 = inv * inv
        skew = m3 * (inv2 * inv)        # == mean(((x-mean)/(std+eps))**3)
        kurt = m4 * (inv2 * inv2)       # == mean(((x-mean)/(std+eps))**4)

        # Rank-4 VPU update replaces concat([mean,std,skew,kurt]) @ w1.
        h = (mean * w1[0:1, :] + std * w1[1:2, :]
             + skew * w1[2:3, :] + kurt * w1[3:4, :] + b1)
        h = jnp.maximum(h, 0.0)
        # TODO(synk): dropout is identity here (eval mode); training-mode
        # dropout would use pltpu.prng_random_bits + masking.
        h = jnp.maximum(
            jnp.dot(h, w2, preferred_element_type=jnp.float32) + b2, 0.0)
        h = jnp.maximum(
            jnp.dot(h, w3, preferred_element_type=jnp.float32) + b3, 0.0)
        return jnp.dot(h, wv, preferred_element_type=jnp.float32) + bv

    out_ref[0, :, :] = half_logits(real_ref[...])
    out_ref[1, :, :] = half_logits(fake_ref[...])


def _pick_batch_tile(batch, num_movies):
    """Largest batch tile s.t. double-buffered real+fake f32 tiles stay <~24MiB
    (safe for v7x's 64 MiB physical VMEM), capped at 512 rows."""
    if batch <= 8:
        return batch                      # full dim -> satisfies (8,128) rule
    # 2 inputs * 2 buffers * tb * M * 4 bytes  <=  24 MiB
    budget_rows = (24 << 20) // (16 * max(num_movies, 1))
    tb = min(batch, 512, max(budget_rows, 8))
    tb = max(8, (tb // 8) * 8)            # multiple of 8 (sublane constraint)
    return tb


def distribution_discriminator(real_ratings, fake_ratings, params,
                               batch_tile=None):
    """real_ratings / fake_ratings: [B, 1, num_movies] (as in the torch module).

    Returns validity logits of shape [2B, 1] (real rows first, then fake)."""
    batch, _, num_movies = real_ratings.shape
    # Contiguous squeeze -> free reshape (no dtype change, no concat, no copy).
    real = real_ratings.reshape(batch, num_movies)
    fake = fake_ratings.reshape(batch, num_movies)

    (w1, b1), (w2, b2), (w3, b3), (wv, bv) = params

    tb = batch_tile if batch_tile is not None else _pick_batch_tile(
        batch, num_movies)
    grid = (pl.cdiv(batch, tb),)

    rate_spec = pl.BlockSpec((tb, num_movies), lambda i: (i, 0))

    def const_spec(arr):                   # VMEM-resident across grid steps
        return pl.BlockSpec(arr.shape, lambda i: (0, 0))

    # VMEM budget: double-buffered real+fake tiles + weights + headroom.
    tile_bytes = 2 * 2 * tb * num_movies * real.dtype.itemsize
    vmem_limit = int(min(max(tile_bytes + (8 << 20), 32 << 20), 64 << 20))

    out = pl.pallas_call(
        _disc_kernel,
        out_shape=jax.ShapeDtypeStruct((2, batch, 1), jnp.float32),
        grid=grid,
        in_specs=[rate_spec, rate_spec,
                  const_spec(w1), const_spec(b1),
                  const_spec(w2), const_spec(b2),
                  const_spec(w3), const_spec(b3),
                  const_spec(wv), const_spec(bv)],
        out_specs=pl.BlockSpec((2, tb, 1), lambda i: (0, i, 0)),
        compiler_params=pltpu.CompilerParams(
            dimension_semantics=("parallel",),
            vmem_limit_bytes=vmem_limit),
    )(real, fake, w1, b1, w2, b2, w3, b3, wv, bv)

    # (2, B, 1) -> (2B, 1): real block then fake block; contiguous, free.
    return out.reshape(2 * batch, 1)


def init_params(key, fc1_size, fc2_size, fc3_size, input_size=4):
    """Deterministic synthetic weights; layout [in, out] (transposed vs torch)."""
    ks = jax.random.split(key, 8)

    def lin(kw, kb, fan_in, fan_out):
        bound = 1.0 / jnp.sqrt(fan_in)
        w = jax.random.uniform(kw, (fan_in, fan_out), jnp.float32, -bound, bound)
        b = jax.random.uniform(kb, (1, fan_out), jnp.float32, -bound, bound)
        return w, b

    return (
        lin(ks[0], ks[1], input_size, fc1_size),
        lin(ks[2], ks[3], fc1_size, fc2_size),
        lin(ks[4], ks[5], fc2_size, fc3_size),
        lin(ks[6], ks[7], fc3_size, 1),
    )


def _reference(real_ratings, fake_ratings, params):
    """Pure-JAX reference mirroring the PyTorch forward."""
    def stats(r):
        mean = jnp.mean(r, axis=1)
        std = jnp.sqrt(jnp.mean((r - mean[:, None]) ** 2, axis=1))
        z = (r - mean[:, None]) / (std[:, None] + 1e-6)
        skew = jnp.mean(z ** 3, axis=1)
        kurt = jnp.mean(z ** 4, axis=1)
        return jnp.stack([mean, std, skew, kurt], axis=1)

    real = jnp.squeeze(real_ratings, axis=1).astype(jnp.float32)
    fake = jnp.squeeze(fake_ratings, axis=1).astype(jnp.float32)
    x = jnp.concatenate([stats(real), stats(fake)], axis=0)
    (w1, b1), (w2, b2), (w3, b3), (wv, bv) = params
    x = jnp.maximum(x @ w1 + b1, 0.0)
    x = jnp.maximum(x @ w2 + b2, 0.0)
    x = jnp.maximum(x @ w3 + b3, 0.0)
    return x @ wv + bv


if __name__ == "__main__":
    key = jax.random.PRNGKey(0)
    k_real, k_fake, k_params, k_real2, k_fake2 = jax.random.split(key, 5)

    fc1_size, fc2_size, fc3_size = 32, 32, 16
    params = init_params(k_params, fc1_size, fc2_size, fc3_size)

    # --- small single-tile check (matches module's tiny-shape usage) ---
    batch, num_movies = 2, 16
    real_ratings = jax.random.uniform(k_real, (batch, 1, num_movies),
                                      jnp.float32, 0.0, 5.0)
    fake_ratings = jax.random.uniform(k_fake, (batch, 1, num_movies),
                                      jnp.float32, 0.0, 5.0)

    validity = distribution_discriminator(real_ratings, fake_ratings, params)
    validity = jax.block_until_ready(validity)
    ref = _reference(real_ratings, fake_ratings, params)
    assert validity.shape == (2 * batch, 1), validity.shape
    assert jnp.allclose(validity, ref, atol=1e-5, rtol=1e-5), (validity, ref)

    # --- multi-tile grid check (exercises the batch-tiled pipeline) ---
    batch2, num_movies2 = 24, 128
    real2 = jax.random.uniform(k_real2, (batch2, 1, num_movies2),
                               jnp.float32, 0.0, 5.0)
    fake2 = jax.random.uniform(k_fake2, (batch2, 1, num_movies2),
                               jnp.float32, 0.0, 5.0)
    validity2 = distribution_discriminator(real2, fake2, params, batch_tile=8)
    validity2 = jax.block_until_ready(validity2)
    ref2 = _reference(real2, fake2, params)
    assert validity2.shape == (2 * batch2, 1), validity2.shape
    assert jnp.allclose(validity2, ref2, atol=1e-5, rtol=1e-5), (validity2, ref2)

    print("KERNEL_OK")
</pallas_src>

<mosaic_0001>
module attributes {stable_mosaic.version = 11 : i64} {
  func.func @_disc_kernel(%arg0: i32, %arg1: memref<2x16xf32, #tpu.memory_space<vmem>>, %arg2: memref<2x16xf32, #tpu.memory_space<vmem>>, %arg3: memref<4x32xf32, #tpu.memory_space<vmem>>, %arg4: memref<1x32xf32, #tpu.memory_space<vmem>>, %arg5: memref<32x32xf32, #tpu.memory_space<vmem>>, %arg6: memref<1x32xf32, #tpu.memory_space<vmem>>, %arg7: memref<32x16xf32, #tpu.memory_space<vmem>>, %arg8: memref<1x16xf32, #tpu.memory_space<vmem>>, %arg9: memref<16x1xf32, #tpu.memory_space<vmem>>, %arg10: memref<1x1xf32, #tpu.memory_space<vmem>>, %arg11: memref<2x2x1xf32, #tpu.memory_space<vmem>>) attributes {dimension_semantics = [#tpu.dimension_semantics<parallel>], iteration_bounds = array<i64: 1>, scalar_prefetch = 0 : i64, scratch_operands = 0 : i64, tpu.core_type = #tpu.core_type<tc>, window_params = [{transform_indices = @transform_0, window_bounds = array<i64: 2, 16>}, {transform_indices = @transform_1, window_bounds = array<i64: 2, 16>}, {pipeline_mode = #tpu.pipeline_mode<synchronous>, transform_indices = @transform_2, window_bounds = array<i64: 4, 32>}, {pipeline_mode = #tpu.pipeline_mode<synchronous>, transform_indices = @transform_3, window_bounds = array<i64: 1, 32>}, {pipeline_mode = #tpu.pipeline_mode<synchronous>, transform_indices = @transform_4, window_bounds = array<i64: 32, 32>}, {pipeline_mode = #tpu.pipeline_mode<synchronous>, transform_indices = @transform_5, window_bounds = array<i64: 1, 32>}, {pipeline_mode = #tpu.pipeline_mode<synchronous>, transform_indices = @transform_6, window_bounds = array<i64: 32, 16>}, {pipeline_mode = #tpu.pipeline_mode<synchronous>, transform_indices = @transform_7, window_bounds = array<i64: 1, 16>}, {pipeline_mode = #tpu.pipeline_mode<synchronous>, transform_indices = @transform_8, window_bounds = array<i64: 16, 1>}, {pipeline_mode = #tpu.pipeline_mode<synchronous>, transform_indices = @transform_9, window_bounds = array<i64: 1, 1>}, {transform_indices = @transform_10, window_bounds = array<i64: 2, 2, 1>}]} {
    %c0 = arith.constant 0 : index
    %c0_0 = arith.constant 0 : index
    %0 = vector.load %arg3[%c0, %c0_0] : memref<4x32xf32, #tpu.memory_space<vmem>>, vector<4x32xf32>
    %c0_1 = arith.constant 0 : index
    %c0_2 = arith.constant 0 : index
    %1 = vector.load %arg4[%c0_1, %c0_2] : memref<1x32xf32, #tpu.memory_space<vmem>>, vector<1x32xf32>
    %c0_3 = arith.constant 0 : index
    %c0_4 = arith.constant 0 : index
    %2 = vector.load %arg5[%c0_3, %c0_4] : memref<32x32xf32, #tpu.memory_space<vmem>>, vector<32x32xf32>
    %c0_5 = arith.constant 0 : index
    %c0_6 = arith.constant 0 : index
    %3 = vector.load %arg6[%c0_5, %c0_6] : memref<1x32xf32, #tpu.memory_space<vmem>>, vector<1x32xf32>
    %c0_7 = arith.constant 0 : index
    %c0_8 = arith.constant 0 : index
    %4 = vector.load %arg7[%c0_7, %c0_8] : memref<32x16xf32, #tpu.memory_space<vmem>>, vector<32x16xf32>
    %c0_9 = arith.constant 0 : index
    %c0_10 = arith.constant 0 : index
    %5 = vector.load %arg8[%c0_9, %c0_10] : memref<1x16xf32, #tpu.memory_space<vmem>>, vector<1x16xf32>
    %c0_11 = arith.constant 0 : index
    %c0_12 = arith.constant 0 : index
    %6 = vector.load %arg9[%c0_11, %c0_12] : memref<16x1xf32, #tpu.memory_space<vmem>>, vector<16x1xf32>
    %c0_13 = arith.constant 0 : index
    %c0_14 = arith.constant 0 : index
    %7 = vector.load %arg10[%c0_13, %c0_14] : memref<1x1xf32, #tpu.memory_space<vmem>>, vector<1x1xf32>
    %c0_15 = arith.constant 0 : index
    %c0_16 = arith.constant 0 : index
    %8 = vector.load %arg1[%c0_15, %c0_16] : memref<2x16xf32, #tpu.memory_space<vmem>>, vector<2x16xf32>
    %cst = arith.constant dense<0.000000e+00> : vector<2xf32>
    %9 = vector.multi_reduction <add>, %8, %cst [1] : vector<2x16xf32> to vector<2xf32>
    %10 = vector.shape_cast %9 : vector<2xf32> to vector<2x1xf32>
    %cst_17 = arith.constant 6.250000e-02 : f32
    %11 = vector.broadcast %cst_17 : f32 to vector<2x1xf32>
    %12 = arith.mulf %10, %11 : vector<2x1xf32>
    %13 = vector.broadcast %12 : vector<2x1xf32> to vector<2x16xf32>
    %14 = arith.subf %8, %13 : vector<2x16xf32>
    %15 = arith.mulf %14, %14 : vector<2x16xf32>
    %16 = arith.mulf %15, %14 : vector<2x16xf32>
    %17 = arith.mulf %15, %15 : vector<2x16xf32>
    %cst_18 = arith.constant dense<0.000000e+00> : vector<2xf32>
    %18 = vector.multi_reduction <add>, %15, %cst_18 [1] : vector<2x16xf32> to vector<2xf32>
    %19 = vector.shape_cast %18 : vector<2xf32> to vector<2x1xf32>
    %cst_19 = arith.constant 6.250000e-02 : f32
    %20 = vector.broadcast %cst_19 : f32 to vector<2x1xf32>
    %21 = arith.mulf %19, %20 : vector<2x1xf32>
    %cst_20 = arith.constant dense<0.000000e+00> : vector<2xf32>
    %22 = vector.multi_reduction <add>, %16, %cst_20 [1] : vector<2x16xf32> to vector<2xf32>
    %23 = vector.shape_cast %22 : vector<2xf32> to vector<2x1xf32>
    %cst_21 = arith.constant 6.250000e-02 : f32
    %24 = vector.broadcast %cst_21 : f32 to vector<2x1xf32>
    %25 = arith.mulf %23, %24 : vector<2x1xf32>
    %cst_22 = arith.constant dense<0.000000e+00> : vector<2xf32>
    %26 = vector.multi_reduction <add>, %17, %cst_22 [1] : vector<2x16xf32> to vector<2xf32>
    %27 = vector.shape_cast %26 : vector<2xf32> to vector<2x1xf32>
    %cst_23 = arith.constant 6.250000e-02 : f32
    %28 = vector.broadcast %cst_23 : f32 to vector<2x1xf32>
    %29 = arith.mulf %27, %28 : vector<2x1xf32>
    %30 = math.sqrt %21 : vector<2x1xf32>
    %cst_24 = arith.constant 9.99999997E-7 : f32
    %31 = vector.broadcast %cst_24 : f32 to vector<2x1xf32>
    %32 = arith.addf %30, %31 : vector<2x1xf32>
    %cst_25 = arith.constant 1.000000e+00 : f32
    %33 = vector.broadcast %cst_25 : f32 to vector<2x1xf32>
    %34 = arith.divf %33, %32 : vector<2x1xf32>
    %35 = arith.mulf %34, %34 : vector<2x1xf32>
    %36 = arith.mulf %35, %34 : vector<2x1xf32>
    %37 = arith.mulf %25, %36 : vector<2x1xf32>
    %38 = arith.mulf %35, %35 : vector<2x1xf32>
    %39 = arith.mulf %29, %38 : vector<2x1xf32>
    %40 = vector.extract_strided_slice %0 {offsets = [0, 0], sizes = [1, 32], strides = [1, 1]} : vector<4x32xf32> to vector<1x32xf32>
    %41 = vector.broadcast %12 : vector<2x1xf32> to vector<2x32xf32>
    %42 = vector.broadcast %40 : vector<1x32xf32> to vector<2x32xf32>
    %43 = arith.mulf %41, %42 : vector<2x32xf32>
    %44 = vector.extract_strided_slice %0 {offsets = [1, 0], sizes = [1, 32], strides = [1, 1]} : vector<4x32xf32> to vector<1x32xf32>
    %45 = vector.broadcast %30 : vector<2x1xf32> to vector<2x32xf32>
    %46 = vector.broadcast %44 : vector<1x32xf32> to vector<2x32xf32>
    %47 = arith.mulf %45, %46 : vector<2x32xf32>
    %48 = arith.addf %43, %47 : vector<2x32xf32>
    %49 = vector.extract_strided_slice %0 {offsets = [2, 0], sizes = [1, 32], strides = [1, 1]} : vector<4x32xf32> to vector<1x32xf32>
    %50 = vector.broadcast %37 : vector<2x1xf32> to vector<2x32xf32>
    %51 = vector.broadcast %49 : vector<1x32xf32> to vector<2x32xf32>
    %52 = arith.mulf %50, %51 : vector<2x32xf32>
    %53 = arith.addf %48, %52 : vector<2x32xf32>
    %54 = vector.extract_strided_slice %0 {offsets = [3, 0], sizes = [1, 32], strides = [1, 1]} : vector<4x32xf32> to vector<1x32xf32>
    %55 = vector.broadcast %39 : vector<2x1xf32> to vector<2x32xf32>
    %56 = vector.broadcast %54 : vector<1x32xf32> to vector<2x32xf32>
    %57 = arith.mulf %55, %56 : vector<2x32xf32>
    %58 = arith.addf %53, %57 : vector<2x32xf32>
    %59 = vector.broadcast %1 : vector<1x32xf32> to vector<2x32xf32>
    %60 = arith.addf %58, %59 : vector<2x32xf32>
    %cst_26 = arith.constant 0.000000e+00 : f32
    %61 = vector.broadcast %cst_26 : f32 to vector<2x32xf32>
    %62 = arith.maximumf %60, %61 : vector<2x32xf32>
    %cst_27 = arith.constant dense<0.000000e+00> : vector<2x32xf32>
    %63 = tpu.matmul %62, %2, %cst_27 {dimension_numbers = #tpu.dot_dimension_numbers<[1], [0], [0], [1], [0, 0, 1, 1], [], []>} : vector<2x32xf32>, vector<32x32xf32>, vector<2x32xf32> -> vector<2x32xf32>
    %64 = vector.broadcast %3 : vector<1x32xf32> to vector<2x32xf32>
    %65 = arith.addf %63, %64 : vector<2x32xf32>
    %cst_28 = arith.constant 0.000000e+00 : f32
    %66 = vector.broadcast %cst_28 : f32 to vector<2x32xf32>
    %67 = arith.maximumf %65, %66 : vector<2x32xf32>
    %cst_29 = arith.constant dense<0.000000e+00> : vector<2x16xf32>
    %68 = tpu.matmul %67, %4, %cst_29 {dimension_numbers = #tpu.dot_dimension_numbers<[1], [0], [0], [1], [0, 0, 1, 1], [], []>} : vector<2x32xf32>, vector<32x16xf32>, vector<2x16xf32> -> vector<2x16xf32>
    %69 = vector.broadcast %5 : vector<1x16xf32> to vector<2x16xf32>
    %70 = arith.addf %68, %69 : vector<2x16xf32>
    %cst_30 = arith.constant 0.000000e+00 : f32
    %71 = vector.broadcast %cst_30 : f32 to vector<2x16xf32>
    %72 = arith.maximumf %70, %71 : vector<2x16xf32>
    %cst_31 = arith.constant dense<0.000000e+00> : vector<2x1xf32>
    %73 = tpu.matmul %72, %6, %cst_31 {dimension_numbers = #tpu.dot_dimension_numbers<[1], [0], [0], [1], [0, 0, 1, 1], [], []>} : vector<2x16xf32>, vector<16x1xf32>, vector<2x1xf32> -> vector<2x1xf32>
    %74 = vector.broadcast %7 : vector<1x1xf32> to vector<2x1xf32>
    %75 = arith.addf %73, %74 : vector<2x1xf32>
    %c0_32 = arith.constant 0 : index
    %c0_33 = arith.constant 0 : index
    %c0_34 = arith.constant 0 : index
    %76 = vector.load %arg11[%c0_32, %c0_33, %c0_34] : memref<2x2x1xf32, #tpu.memory_space<vmem>>, vector<1x2x1xf32>
    %77 = vector.shape_cast %76 : vector<1x2x1xf32> to vector<2x1xf32>
    %78 = vector.shape_cast %75 : vector<2x1xf32> to vector<1x2x1xf32>
    tpu.vector_store %arg11[%c0_32, %c0_33, %c0_34], %78 {strides = array<i32>} : memref<2x2x1xf32, #tpu.memory_space<vmem>>, vector<1x2x1xf32>,
    %c0_35 = arith.constant 0 : index
    %c0_36 = arith.constant 0 : index
    %79 = vector.load %arg2[%c0_35, %c0_36] : memref<2x16xf32, #tpu.memory_space<vmem>>, vector<2x16xf32>
    %cst_37 = arith.constant dense<0.000000e+00> : vector<2xf32>
    %80 = vector.multi_reduction <add>, %79, %cst_37 [1] : vector<2x16xf32> to vector<2xf32>
    %81 = vector.shape_cast %80 : vector<2xf32> to vector<2x1xf32>
    %cst_38 = arith.constant 6.250000e-02 : f32
    %82 = vector.broadcast %cst_38 : f32 to vector<2x1xf32>
    %83 = arith.mulf %81, %82 : vector<2x1xf32>
    %84 = vector.broadcast %83 : vector<2x1xf32> to vector<2x16xf32>
    %85 = arith.subf %79, %84 : vector<2x16xf32>
    %86 = arith.mulf %85, %85 : vector<2x16xf32>
    %87 = arith.mulf %86, %85 : vector<2x16xf32>
    %88 = arith.mulf %86, %86 : vector<2x16xf32>
    %cst_39 = arith.constant dense<0.000000e+00> : vector<2xf32>
    %89 = vector.multi_reduction <add>, %86, %cst_39 [1] : vector<2x16xf32> to vector<2xf32>
    %90 = vector.shape_cast %89 : vector<2xf32> to vector<2x1xf32>
    %cst_40 = arith.constant 6.250000e-02 : f32
    %91 = vector.broadcast %cst_40 : f32 to vector<2x1xf32>
    %92 = arith.mulf %90, %91 : vector<2x1xf32>
    %cst_41 = arith.constant dense<0.000000e+00> : vector<2xf32>
    %93 = vector.multi_reduction <add>, %87, %cst_41 [1] : vector<2x16xf32> to vector<2xf32>
    %94 = vector.shape_cast %93 : vector<2xf32> to vector<2x1xf32>
    %cst_42 = arith.constant 6.250000e-02 : f32
    %95 = vector.broadcast %cst_42 : f32 to vector<2x1xf32>
    %96 = arith.mulf %94, %95 : vector<2x1xf32>
    %cst_43 = arith.constant dense<0.000000e+00> : vector<2xf32>
    %97 = vector.multi_reduction <add>, %88, %cst_43 [1] : vector<2x16xf32> to vector<2xf32>
    %98 = vector.shape_cast %97 : vector<2xf32> to vector<2x1xf32>
    %cst_44 = arith.constant 6.250000e-02 : f32
    %99 = vector.broadcast %cst_44 : f32 to vector<2x1xf32>
    %100 = arith.mulf %98, %99 : vector<2x1xf32>
    %101 = math.sqrt %92 : vector<2x1xf32>
    %cst_45 = arith.constant 9.99999997E-7 : f32
    %102 = vector.broadcast %cst_45 : f32 to vector<2x1xf32>
    %103 = arith.addf %101, %102 : vector<2x1xf32>
    %cst_46 = arith.constant 1.000000e+00 : f32
    %104 = vector.broadcast %cst_46 : f32 to vector<2x1xf32>
    %105 = arith.divf %104, %103 : vector<2x1xf32>
    %106 = arith.mulf %105, %105 : vector<2x1xf32>
    %107 = arith.mulf %106, %105 : vector<2x1xf32>
    %108 = arith.mulf %96, %107 : vector<2x1xf32>
    %109 = arith.mulf %106, %106 : vector<2x1xf32>
    %110 = arith.mulf %100, %109 : vector<2x1xf32>
    %111 = vector.extract_strided_slice %0 {offsets = [0, 0], sizes = [1, 32], strides = [1, 1]} : vector<4x32xf32> to vector<1x32xf32>
    %112 = vector.broadcast %83 : vector<2x1xf32> to vector<2x32xf32>
    %113 = vector.broadcast %111 : vector<1x32xf32> to vector<2x32xf32>
    %114 = arith.mulf %112, %113 : vector<2x32xf32>
    %115 = vector.extract_strided_slice %0 {offsets = [1, 0], sizes = [1, 32], strides = [1, 1]} : vector<4x32xf32> to vector<1x32xf32>
    %116 = vector.broadcast %101 : vector<2x1xf32> to vector<2x32xf32>
    %117 = vector.broadcast %115 : vector<1x32xf32> to vector<2x32xf32>
    %118 = arith.mulf %116, %117 : vector<2x32xf32>
    %119 = arith.addf %114, %118 : vector<2x32xf32>
    %120 = vector.extract_strided_slice %0 {offsets = [2, 0], sizes = [1, 32], strides = [1, 1]} : vector<4x32xf32> to vector<1x32xf32>
    %121 = vector.broadcast %108 : vector<2x1xf32> to vector<2x32xf32>
    %122 = vector.broadcast %120 : vector<1x32xf32> to vector<2x32xf32>
    %123 = arith.mulf %121, %122 : vector<2x32xf32>
    %124 = arith.addf %119, %123 : vector<2x32xf32>
    %125 = vector.extract_strided_slice %0 {offsets = [3, 0], sizes = [1, 32], strides = [1, 1]} : vector<4x32xf32> to vector<1x32xf32>
    %126 = vector.broadcast %110 : vector<2x1xf32> to vector<2x32xf32>
    %127 = vector.broadcast %125 : vector<1x32xf32> to vector<2x32xf32>
    %128 = arith.mulf %126, %127 : vector<2x32xf32>
    %129 = arith.addf %124, %128 : vector<2x32xf32>
    %130 = vector.broadcast %1 : vector<1x32xf32> to vector<2x32xf32>
    %131 = arith.addf %129, %130 : vector<2x32xf32>
    %cst_47 = arith.constant 0.000000e+00 : f32
    %132 = vector.broadcast %cst_47 : f32 to vector<2x32xf32>
    %133 = arith.maximumf %131, %132 : vector<2x32xf32>
    %cst_48 = arith.constant dense<0.000000e+00> : vector<2x32xf32>
    %134 = tpu.matmul %133, %2, %cst_48 {dimension_numbers = #tpu.dot_dimension_numbers<[1], [0], [0], [1], [0, 0, 1, 1], [], []>} : vector<2x32xf32>, vector<32x32xf32>, vector<2x32xf32> -> vector<2x32xf32>
    %135 = vector.broadcast %3 : vector<1x32xf32> to vector<2x32xf32>
    %136 = arith.addf %134, %135 : vector<2x32xf32>
    %cst_49 = arith.constant 0.000000e+00 : f32
    %137 = vector.broadcast %cst_49 : f32 to vector<2x32xf32>
    %138 = arith.maximumf %136, %137 : vector<2x32xf32>
    %cst_50 = arith.constant dense<0.000000e+00> : vector<2x16xf32>
    %139 = tpu.matmul %138, %4, %cst_50 {dimension_numbers = #tpu.dot_dimension_numbers<[1], [0], [0], [1], [0, 0, 1, 1], [], []>} : vector<2x32xf32>, vector<32x16xf32>, vector<2x16xf32> -> vector<2x16xf32>
    %140 = vector.broadcast %5 : vector<1x16xf32> to vector<2x16xf32>
    %141 = arith.addf %139, %140 : vector<2x16xf32>
    %cst_51 = arith.constant 0.000000e+00 : f32
    %142 = vector.broadcast %cst_51 : f32 to vector<2x16xf32>
    %143 = arith.maximumf %141, %142 : vector<2x16xf32>
    %cst_52 = arith.constant dense<0.000000e+00> : vector<2x1xf32>
    %144 = tpu.matmul %143, %6, %cst_52 {dimension_numbers = #tpu.dot_dimension_numbers<[1], [0], [0], [1], [0, 0, 1, 1], [], []>} : vector<2x16xf32>, vector<16x1xf32>, vector<2x1xf32> -> vector<2x1xf32>
    %145 = vector.broadcast %7 : vector<1x1xf32> to vector<2x1xf32>
    %146 = arith.addf %144, %145 : vector<2x1xf32>
    %c1 = arith.constant 1 : index
    %c0_53 = arith.constant 0 : index
    %c0_54 = arith.constant 0 : index
    %147 = vector.load %arg11[%c1, %c0_53, %c0_54] : memref<2x2x1xf32, #tpu.memory_space<vmem>>, vector<1x2x1xf32>
    %148 = vector.shape_cast %147 : vector<1x2x1xf32> to vector<2x1xf32>
    %149 = vector.shape_cast %146 : vector<2x1xf32> to vector<1x2x1xf32>
    tpu.vector_store %arg11[%c1, %c0_53, %c0_54], %149 {strides = array<i32>} : memref<2x2x1xf32, #tpu.memory_space<vmem>>, vector<1x2x1xf32>,
    return
  }
  func.func @transform_0(%arg0: i32) -> (i32, i32) {
    %c0_i32 = arith.constant 0 : i32
    %c0_i32_0 = arith.constant 0 : i32
    return %arg0, %c0_i32 : i32, i32
  }
  func.func @transform_1(%arg0: i32) -> (i32, i32) {
    %c0_i32 = arith.constant 0 : i32
    %c0_i32_0 = arith.constant 0 : i32
    return %arg0, %c0_i32 : i32, i32
  }
  func.func @transform_2(%arg0: i32) -> (i32, i32) {
    %c0_i32 = arith.constant 0 : i32
    %c0_i32_0 = arith.constant 0 : i32
    %c0_i32_1 = arith.constant 0 : i32
    return %c0_i32, %c0_i32_0 : i32, i32
  }
  func.func @transform_3(%arg0: i32) -> (i32, i32) {
    %c0_i32 = arith.constant 0 : i32
    %c0_i32_0 = arith.constant 0 : i32
    %c0_i32_1 = arith.constant 0 : i32
    return %c0_i32, %c0_i32_0 : i32, i32
  }
  func.func @transform_4(%arg0: i32) -> (i32, i32) {
    %c0_i32 = arith.constant 0 : i32
    %c0_i32_0 = arith.constant 0 : i32
    %c0_i32_1 = arith.constant 0 : i32
    return %c0_i32, %c0_i32_0 : i32, i32
  }
  func.func @transform_5(%arg0: i32) -> (i32, i32) {
    %c0_i32 = arith.constant 0 : i32
    %c0_i32_0 = arith.constant 0 : i32
    %c0_i32_1 = arith.constant 0 : i32
    return %c0_i32, %c0_i32_0 : i32, i32
  }
  func.func @transform_6(%arg0: i32) -> (i32, i32) {
    %c0_i32 = arith.constant 0 : i32
    %c0_i32_0 = arith.constant 0 : i32
    %c0_i32_1 = arith.constant 0 : i32
    return %c0_i32, %c0_i32_0 : i32, i32
  }
  func.func @transform_7(%arg0: i32) -> (i32, i32) {
    %c0_i32 = arith.constant 0 : i32
    %c0_i32_0 = arith.constant 0 : i32
    %c0_i32_1 = arith.constant 0 : i32
    return %c0_i32, %c0_i32_0 : i32, i32
  }
  func.func @transform_8(%arg0: i32) -> (i32, i32) {
    %c0_i32 = arith.constant 0 : i32
    %c0_i32_0 = arith.constant 0 : i32
    %c0_i32_1 = arith.constant 0 : i32
    return %c0_i32, %c0_i32_0 : i32, i32
  }
  func.func @transform_9(%arg0: i32) -> (i32, i32) {
    %c0_i32 = arith.constant 0 : i32
    %c0_i32_0 = arith.constant 0 : i32
    %c0_i32_1 = arith.constant 0 : i32
    return %c0_i32, %c0_i32_0 : i32, i32
  }
  func.func @transform_10(%arg0: i32) -> (i32, i32, i32) {
    %c0_i32 = arith.constant 0 : i32
    %c0_i32_0 = arith.constant 0 : i32
    %c0_i32_1 = arith.constant 0 : i32
    return %c0_i32, %arg0, %c0_i32_0 : i32, i32, i32
  }
}

</mosaic_0001>

<bundles_post_ra>
// kernel: tpu_custom_call.1
= control target key start
LH: loop header
LB: loop body
LE: loop exit
PB: predicated region body
PF: predicated region fallthrough
CT: control target
= control target key end

     0   :  { %vm53_vm0 = vcmask 123904   ;;  %v771_v16 = vmov 0.0|0.0   ;;  %vm772_vm1 = vmmov 0   ;;  %v773_v20 = vmov 0.0   ;;  %s946_s0 = inlined_call_operand.vmem [shape: f32[2,16], index: 0, kind: input, shape index: {}]   ;;  %s947_s1 = inlined_call_operand.vmem [shape: f32[2,16], index: 1, kind: input, shape index: {}]   ;;  %s948_s4 = inlined_call_operand.vmem [shape: f32[32,32], index: 4, kind: input, shape index: {}]   ;;  %s949_s2 = inlined_call_operand.vmem [shape: f32[4,32], index: 2, kind: input, shape index: {}]   ;;  %s950_s3 = inlined_call_operand.vmem [shape: f32[1,32], index: 3, kind: input, shape index: {}]   ;;  %s951_s6 = inlined_call_operand.vmem [shape: f32[32,16], index: 6, kind: input, shape index: {}]   ;;  %s952_s5 = inlined_call_operand.vmem [shape: f32[1,32], index: 5, kind: input, shape index: {}]   ;;  %s953_s8 = inlined_call_operand.vmem [shape: f32[16,1], index: 8, kind: input, shape index: {}]   ;;  %s954_s9 = inlined_call_operand.<no memory space> [shape: f32[1,1], index: 9, kind: input, shape index: {}]   ;;  %s955_s7 = inlined_call_operand.vmem [shape: f32[1,16], index: 7, kind: input, shape index: {}]   ;;  %s956_s10 = inlined_call_operand.vmem [shape: f32[2,2,1], index: 10, kind: output, shape index: {}]  }
   0x1   :  { %v52_v0 = vld [vmem:[%s946_s0] sm:$0x3]  ;;  %v40_v14 = vld [vmem:[%s948_s4 + $0x8] sm:$0xff]  ;;  %730 = vmatprep.subr.bf16.mxu0 %v771_v16  ;;  %736 = vmatprep.subr.bf16.mxu1 %v771_v16  ;;  %v41_v17 = vld [vmem:[%s948_s4 + $0x10] sm:$0xff]  ;;  %v89_v38 = vlaneseq  ;;  %vm126_vm4 = vcmask 261120   ;;  %vm287_vm7 = vcmask 130048  }
   0x2   :  { %v54_v1 = vsel %vm53_vm0, %v52_v0, 0.0  ;;  %v363_v6 = vld [vmem:[%s947_s1] sm:$0x3]  ;;  %v42_v18 = vld [vmem:[%s948_s4 + $0x18] sm:$0xff]  ;;  %680 = vmatprep.mubr.msk.f32.mxu0 %vm772_vm1, %v773_v20  ;;  %691 = vmatprep.mubr.msk.f32.mxu1 %vm772_vm1, %v773_v20  ;;  %vm361_vm8 = vcmask 1024  }
   0x3   :  { %55 = vadd.xlane.f32.xlu0 %v54_v1  ;;  %v364_v10 = vsel %vm53_vm0, %v363_v6, 0.0  ;;  %v39_v13 = vld [vmem:[%s948_s4] sm:$0xff]  ;;  %v861_v19 = vpack.c.bf16 %v42_v18, %v41_v17  ;;  %v90_v39 = vshrl.u32 %v89_v38, 7 }
   0x4   :  { %v849_v15 = vpack.c.bf16 %v40_v14, %v39_v13  ;;  %v37_v43 = vld [vmem:[%s949_s2] sm:$0xf] }
   0x5   :  { %v96_v41 = vsub.s32 1, %v90_v39  ;;  %v91_v42 = vsub.s32 0, %v90_v39  ;;  %v102_v44 = vsub.s32 2, %v90_v39  ;;  %v108_v50 = vsub.s32 3, %v90_v39  ;;  %v635_v1 = vld [vmem:[%s950_s3] ss:$0 sm:$0xff] }
   0x6   :  { %732 = vmatpush3.bf16.msra.mxu0 %v849_v15  ;;  %v636_v38 = vld [vmem:[%s952_s5] ss:$0 sm:$0xff] }
   0x7   :  { %733 = vmatprep.subr.bf16.mxu0 %v771_v16  ;;  %v97_v45 = vrot.slane %v37_v43, %v96_v41  ;;  %v92_v48 = vrot.slane %v37_v43, %v91_v42  ;;  %v103_v51 = vrot.slane %v37_v43, %v102_v44  ;;  %v109_v59 = vrot.slane %v37_v43, %v108_v50 }
   0xa   :  { %735 = vmatpush3.bf16.msra.mxu0 %v861_v19 }
   0xb   :  { %742 = vmatprep.subr.bf16.mxu0 %v771_v16 }
  0x90   :  { %v56_v2 = vpop.xlane.xlu0 %55 }
  0x91   :  { %v833_v3 = vmul.f32 0.0625, %v56_v2 }
  0x93   :  { %v58_v4 = vsub.f32 %v52_v0, %v833_v3  ;;  %v93_v57 = vmul.f32 %v92_v48, %v833_v3  ;;  %v44_v3 = vld [vmem:[%s951_s6] sm:$0xff] }
  0x95   :  { %v59_v5 = vmul.f32 %v58_v4, %v58_v4 }
  0x97   :  { %v62_v7 = vsel %vm53_vm0, %v59_v5, 0.0  ;;  %v60_v8 = vmul.f32 %v59_v5, %v58_v4  ;;  %v61_v11 = vmul.f32 %v59_v5, %v59_v5 }
  0x98   :  { %63 = vadd.xlane.f32.xlu0 %v62_v7 }
  0x99   :  { %v66_v9 = vsel %vm53_vm0, %v60_v8, 0.0  ;;  %v70_v12 = vsel %vm53_vm0, %v61_v11, 0.0  ;;  %v46_v8 = vld [vmem:[%s951_s6 + $0x10] sm:$0xff] }
  0x9a   :  { %67 = vadd.xlane.f32.xlu1 %v66_v9  ;;  %v47_v9 = vld [vmem:[%s951_s6 + $0x18] sm:$0xff] }
  0x9c   :  { %365 = vadd.xlane.f32.xlu0 %v364_v10  ;;  %v901_v10 = vpack.c.bf16 %v47_v9, %v46_v8 }
  0x9e   :  { %71 = vadd.xlane.f32.xlu1 %v70_v12 }
 0x125   :  { %v64_v21 = vpop.xlane.xlu0 %63 }
 0x126   :  { %v65_v22 = vmul.f32 0.0625, %v64_v21 }
 0x127   :  { %v68_v40 = vpop.xlane.xlu1 %67 }
 0x128   :  { %763 = vrsqrt.f32 %v65_v22  ;;  %vm76_vm2 = vcmp.eq.f32.partialorder %v65_v22, inf  ;;  %v79_v34 = vand.u32 2147483648, %v65_v22  ;;  %vm78_vm3 = vcmp.eq.f32.partialorder %v65_v22, 0.0 }
 0x129   :  { %v366_v23 = vpop.xlane.xlu0 %365  ;;  %v69_v52 = vmul.f32 0.0625, %v68_v40 }
 0x12a   :  { %v869_v24 = vmul.f32 0.0625, %v366_v23 }
 0x12b   :  { %v72_v47 = vpop.xlane.xlu1 %71 }
 0x12c   :  { %v368_v25 = vsub.f32 %v363_v6, %v869_v24  ;;  %v73_v56 = vmul.f32 0.0625, %v72_v47  ;;  %v45_v6 = vld [vmem:[%s951_s6 + $0x8] sm:$0xff] }
 0x12d   :  { %v891_v7 = vpack.c.bf16 %v45_v6, %v44_v3  ;;  %v50_v47 = vld [vmem:[%s953_s8 + $0x8] sm:$0xff] }
 0x12e   :  { %v369_v26 = vmul.f32 %v368_v25, %v368_v25 }
 0x12f   :  { %738 = vmatpush3.bf16.msra.mxu1 %v891_v7 }
 0x130   :  { %v372_v27 = vsel %vm53_vm0, %v369_v26, 0.0  ;;  %v370_v28 = vmul.f32 %v369_v26, %v368_v25  ;;  %v371_v29 = vmul.f32 %v369_v26, %v369_v26  ;;  %739 = vmatprep.subr.bf16.mxu1 %v771_v16 }
 0x131   :  { %373 = vadd.xlane.f32.xlu1 %v372_v27 }
 0x132   :  { %v764_v30 = vpop.eup %763  ;;  %v376_v31 = vsel %vm53_vm0, %v370_v28, 0.0  ;;  %v380_v32 = vsel %vm53_vm0, %v371_v29, 0.0 }
 0x133   :  { %v75_v33 = vmul.f32 %v764_v30, %v65_v22  ;;  %377 = vadd.xlane.f32.xlu0 %v376_v31  ;;  %741 = vmatpush3.bf16.msra.mxu1 %v901_v10 }
 0x134   :  { %745 = vmatprep.subr.bf16.mxu1 %v771_v16 }
 0x135   :  { %v77_v35 = vsel %vm76_vm2, %v65_v22, %v75_v33  ;;  %381 = vadd.xlane.f32.xlu1 %v380_v32 }
 0x136   :  { %v80_v36 = vsel %vm78_vm3, %v79_v34, %v77_v35  ;;  %v399_v34 = vmul.f32 %v869_v24, %v92_v48 }
 0x137   :  { %v81_v37 = vadd.f32 1e-06, %v80_v36  ;;  %v98_v54 = vmul.f32 %v97_v45, %v80_v36 }
 0x139   :  { %765 = vrcp.f32 %v81_v37  ;;  %v99_v61 = vadd.f32 %v98_v54, %v93_v57 }
 0x143   :  { %v766_v46 = vpop.eup %765 }
 0x144   :  { %v84_v49 = vmul.f32 %v766_v46, %v766_v46 }
 0x146   :  { %v85_v53 = vmul.f32 %v766_v46, %v84_v49  ;;  %v87_v55 = vmul.f32 %v84_v49, %v84_v49  ;;  %v638_v49 = vld [vmem:[%s955_s7] ss:$0 sm:$0xff] }
 0x148   :  { %v86_v58 = vmul.f32 %v85_v53, %v69_v52  ;;  %v88_v60 = vmul.f32 %v87_v55, %v73_v56 }
 0x14a   :  { %v104_v62 = vmul.f32 %v103_v51, %v86_v58  ;;  %v110_v0 = vmul.f32 %v109_v59, %v88_v60 }
 0x14c   :  { %v105_v63 = vadd.f32 %v104_v62, %v99_v61 }
 0x14e   :  { %v111_v2 = vadd.f32 %v110_v0, %v105_v63 }
 0x150   :  { %v118_v4 = vadd.f32 %v635_v1, %v111_v2 }
 0x152   :  { %v119_v5 = vmax.f32 %v118_v4, 0.0 }
 0x154   :  { %681 = vmatmul.mubr.msk.f32.vlgmr.msra.gmra.mrb[0].mxu0 %vm126_vm4, %v119_v5 }
 0x155   :  { %698 = vmatprep.mubr.msk.f32.mxu0 %vm772_vm1, %v773_v20 }
 0x1be   :  { %v374_v11 = vpop.xlane.xlu1 %373 }
 0x1bf   :  { %v375_v12 = vmul.f32 0.0625, %v374_v11 }
 0x1c0   :  { %v378_v26 = vpop.xlane.xlu0 %377 }
 0x1c1   :  { %767 = vrsqrt.f32 %v375_v12  ;;  %vm386_vm5 = vcmp.eq.f32.partialorder %v375_v12, inf  ;;  %v389_v17 = vand.u32 2147483648, %v375_v12  ;;  %vm388_vm6 = vcmp.eq.f32.partialorder %v375_v12, 0.0 }
 0x1c2   :  { %v379_v27 = vmul.f32 0.0625, %v378_v26  ;;  %v382_v29 = vpop.xlane.xlu1 %381 }
 0x1c3   :  { %v383_v32 = vmul.f32 0.0625, %v382_v29 }
 0x1cb   :  { %v768_v13 = vpop.eup %767 }
 0x1cc   :  { %v385_v14 = vmul.f32 %v768_v13, %v375_v12 }
 0x1ce   :  { %v387_v18 = vsel %vm386_vm5, %v375_v12, %v385_v14 }
 0x1cf   :  { %v390_v21 = vsel %vm388_vm6, %v389_v17, %v387_v18 }
 0x1d0   :  { %v391_v22 = vadd.f32 1e-06, %v390_v21  ;;  %v400_v33 = vmul.f32 %v390_v21, %v97_v45 }
 0x1d2   :  { %769 = vrcp.f32 %v391_v22  ;;  %v401_v37 = vadd.f32 %v400_v33, %v399_v34 }
 0x1dc   :  { %v770_v23 = vpop.eup %769 }
 0x1dd   :  { %v394_v25 = vmul.f32 %v770_v23, %v770_v23 }
 0x1df   :  { %v395_v28 = vmul.f32 %v770_v23, %v394_v25  ;;  %v397_v31 = vmul.f32 %v394_v25, %v394_v25 }
 0x1e1   :  { %v396_v30 = vmul.f32 %v395_v28, %v379_v27  ;;  %v398_v36 = vmul.f32 %v397_v31, %v383_v32 }
 0x1e3   :  { %v402_v35 = vmul.f32 %v396_v30, %v103_v51  ;;  %v404_v40 = vmul.f32 %v398_v36, %v109_v59 }
 0x1e5   :  { %v403_v39 = vadd.f32 %v402_v35, %v401_v37 }
 0x1e7   :  { %v405_v44 = vadd.f32 %v404_v40, %v403_v39 }
 0x1e9   :  { %v406_v24 = vadd.f32 %v635_v1, %v405_v44 }
 0x1eb   :  { %v407_v45 = vmax.f32 %v406_v24, 0.0 }
 0x227   :  { %v196_v41 = vpop.f32.mrb[0].mxu0 }
 0x228   :  { %v197_v42 = vadd.f32 %v636_v38, %v196_v41  ;;  %v682_v43 = vpop.f32.mrb[1].mxu0 }
 0x22a   :  { %v200_v46 = vmax.f32 %v197_v42, 0.0 }
 0x22c   :  { %692 = vmatmul.mubr.msk.f32.vlgmr.msra.gmra.mrb[0].mxu1 %vm126_vm4, %v200_v46 }
 0x22d   :  { %747 = vmatpush3.bf16.msra.mxu1 %v849_v15  ;;  %709 = vmatprep.mubr.msk.f32.mxu1 %vm772_vm1, %v773_v20  ;;  %v49_v15 = vld [vmem:[%s953_s8] sm:$0xff] }
 0x22e   :  { %748 = vmatprep.subr.bf16.mxu1 %v771_v16  ;;  %v743_v48 = vpack.c.bf16 %v50_v47, %v49_v15 }
 0x230   :  { %744 = vmatpush3.bf16.msra.mxu0 %v743_v48 }
 0x231   :  { %750 = vmatpush3.bf16.msra.mxu1 %v861_v19  ;;  %751 = vmatprep.subr.bf16.mxu0 %v771_v16  ;;  %v15_v19 = vstv %s954_s9 }
 0x232   :  { %757 = vmatprep.subr.bf16.mxu1 %v771_v16  ;;  %16 = vst [vmem:[#allocation2] sm:$0x1] %v15_v19 }
 0x234   :  { %710 = vmatmul.mubr.msk.f32.vlgmr.msra.gmra.mrb[2].mxu1 %vm126_vm4, %v407_v45 }
 0x235   :  { %727 = vmatprep.mubr.msk.f32.mxu1 %vm772_vm1, %v773_v20  ;;  %759 = vmatpush3.bf16.msra.mxu1 %v743_v48 }
 0x239   :  { %v640_v58 = vld [vmem:[#allocation2] ss:$0 sm:$0xff] }
 0x2ff   :  { %v276_v50 = vpop.f32.mrb[0].mxu1 }
 0x300   :  { %v277_v51 = vadd.f32 %v638_v49, %v276_v50  ;;  %v693_v52 = vpop.f32.mrb[1].mxu1 }
 0x302   :  { %v280_v53 = vmax.f32 %v277_v51, 0.0 }
 0x304   :  { %699 = vmatmul.mubr.msk.f32.vlgmr.msra.gmra.mrb[2].mxu0 %vm287_vm7, %v280_v53 }
 0x305   :  { %753 = vmatpush3.bf16.msra.mxu0 %v891_v7  ;;  %720 = vmatprep.mubr.msk.f32.mxu0 %vm772_vm1, %v773_v20 }
 0x306   :  { %754 = vmatprep.subr.bf16.mxu0 %v771_v16 }
 0x307   :  { %v477_v54 = vpop.f32.mrb[2].mxu1 }
 0x308   :  { %v478_v55 = vadd.f32 %v636_v38, %v477_v54  ;;  %v711_v56 = vpop.f32.mrb[3].mxu1 }
 0x309   :  { %756 = vmatpush3.bf16.msra.mxu0 %v901_v10 }
 0x30a   :  { %v481_v57 = vmax.f32 %v478_v55, 0.0 }
 0x30c   :  { %721 = vmatmul.mubr.msk.f32.vlgmr.msra.gmra.mrb[4].mxu0 %vm126_vm4, %v481_v57 }
 0x3d7   :  { %v357_v59 = vpop.f32.mrb[2].mxu0 }
 0x3d8   :  { %v358_v60 = vadd.f32 %v640_v58, %v357_v59  ;;  %v700_v61 = vpop.f32.mrb[3].mxu0 }
 0x3da   :  { %362 = vst.msk [vmem:[%s956_s10] sm:$0x3] %vm361_vm8, %v358_v60 }
 0x3df   :  { %v551_v20 = vpop.f32.mrb[4].mxu0 }
 0x3e0   :  { %v552_v62 = vadd.f32 %v638_v49, %v551_v20  ;;  %v722_v16 = vpop.f32.mrb[5].mxu0 }
 0x3e2   :  { %v555_v63 = vmax.f32 %v552_v62, 0.0 }
 0x3e4   :  { %728 = vmatmul.mubr.msk.f32.vlgmr.msra.gmra.mrb[4].mxu1 %vm287_vm7, %v555_v63 }
 0x4b7   :  { %v625_v0 = vpop.f32.mrb[4].mxu1 }
 0x4b8   :  { %v626_v1 = vadd.f32 %v640_v58, %v625_v0  ;;  %v729_v2 = vpop.f32.mrb[5].mxu1 }
 0x4ba   :  { %645 = vst.msk [vmem:[%s956_s10 + $0x2] sm:$0x3] %vm361_vm8, %v626_v1 }

</bundles_post_ra>
